<compile_context>
chip_gen: v7x
topology: tpu7x:2x2x1
jax: 0.10.0
libtpu: 0.0.40
codegen_flags: <defaults>
</compile_context>

<pallas_src>
import functools

import jax
import jax.numpy as jnp
from jax.experimental import pallas as pl
from jax.experimental.pallas import tpu as pltpu


def _vmem_capacity_bytes():
    """Per-core VMEM capacity; generation-aware fallback if the query fails."""
    try:
        return int(pltpu.get_tpu_info().vmem_capacity_bytes)
    except Exception:
        pass
    try:
        kind = jax.devices()[0].device_kind.lower()
    except Exception:
        kind = ""
    # v5e / v6e (Trillium) carry 128 MiB of VMEM per TensorCore; default to the
    # conservative per-core figure (v7x: 64 MiB) for anything unrecognized.
    if ("v5 lite" in kind or "v5e" in kind or "v5litepod" in kind
            or "v6" in kind or "trillium" in kind):
        return 128 << 20
    return 64 << 20


def _pick_tiles(B, C, S, itemsize, vmem_budget_bytes):
    """Choose (batch_tile Bb, spatial_tile TS) for the (Bb, C, TS) block.

    Per lane column (per batch row) we keep: double-buffered input + output
    blocks (2 * 2 * C * itemsize) plus ~3 f32-wide intermediates in the body.
    """
    bytes_per_col = C * (4 * itemsize + 3 * 4)

    # Lane tile from the VMEM budget; additionally cap a single input block at
    # ~8 MiB (long, unmasked DMAs while the grid still pipelines) and keep the
    # raw lane count sane.
    ts = vmem_budget_bytes // max(bytes_per_col, 1)
    ts = min(ts, (8 << 20) // max(C * itemsize, 1), 32768)
    if ts >= S:
        TS = S
    else:
        TS = max(128, (ts // 128) * 128)

    # Keep >= 4 grid steps (>= 2 per v7x TensorCore) so every core pipelines,
    # as long as the spatial axis can still be split into 128-lane tiles.
    min_steps = 4
    while B * pl.cdiv(S, TS) < min_steps:
        new_ts = max(128, ((TS // 2) // 128) * 128)
        if new_ts >= TS or new_ts >= S:
            break
        TS = new_ts

    # When one block already covers the full spatial extent and C is tiny
    # (sublane-starved), pack several batch rows per step to amortize the
    # ~0.35 us per-step overhead.  Bb divides B (no partial batch blocks) and
    # we keep >= min_steps steps whenever B allows.
    Bb = 1
    if TS >= S and C * itemsize < 32 and B > 1:
        budget_rows = max(1, vmem_budget_bytes // max(S * bytes_per_col, 1))
        step_rows = max(1, B // min_steps)
        cap = int(min(B, budget_rows, step_rows))
        for d in range(cap, 0, -1):
            if B % d == 0:
                Bb = d
                break
    return Bb, TS


def _ln_channel_kernel(x_ref, w_ref, b_ref, o_ref, *, eps, inv_c):
    # x_ref / o_ref: (Bb, C, TS)   w_ref / b_ref: (1, C, 1)
    x = x_ref[...].astype(jnp.float32)
    u = jnp.sum(x, axis=1, keepdims=True) * inv_c          # E[x]   over channels
    ex2 = jnp.sum(x * x, axis=1, keepdims=True) * inv_c    # E[x^2] over channels
    var = jnp.maximum(ex2 - u * u, 0.0)                    # one-pass variance, clamped
    inv = jax.lax.rsqrt(var + eps)                         # rsqrt -> EUP slot
    w = w_ref[...].astype(jnp.float32)                     # broadcasts over lanes
    b = b_ref[...].astype(jnp.float32)
    o_ref[...] = ((x - u) * (w * inv) + b).astype(o_ref.dtype)


def layer_norm_channel(x, weight, bias, *, eps=1e-6, spatial_tile=None,
                       batch_tile=None):
    """x: [B, C, H, W, D]; weight, bias: [C].  Returns same shape/dtype as x."""
    B, C, H, W, D = x.shape
    S = H * W * D
    itemsize = jnp.dtype(x.dtype).itemsize

    # Raise the scoped VMEM limit (defaults are 16/32 MiB) but leave headroom;
    # the tile budget takes ~2/3 of it (double-buffering already counted).
    vmem_cap = _vmem_capacity_bytes()
    vmem_limit = int(min(vmem_cap * 3 // 4, 96 << 20))
    budget = vmem_limit * 2 // 3

    Bb, TS = _pick_tiles(B, C, S, itemsize, budget)
    if spatial_tile is not None:
        TS = min(int(spatial_tile), S)
        if TS < S:
            TS = max(128, (TS // 128) * 128)   # lane alignment unless full extent
    if batch_tile is not None:
        Bb = max(1, min(int(batch_tile), B))

    x3 = x.reshape(B, C, S)
    w3 = weight.reshape(1, C, 1)
    b3 = bias.reshape(1, C, 1)

    grid = (pl.cdiv(B, Bb), pl.cdiv(S, TS))
    kernel = functools.partial(_ln_channel_kernel, eps=float(eps), inv_c=1.0 / C)

    out3 = pl.pallas_call(
        kernel,
        out_shape=jax.ShapeDtypeStruct((B, C, S), x.dtype),
        grid_spec=pltpu.PrefetchScalarGridSpec(
            num_scalar_prefetch=0,
            grid=grid,
            in_specs=[
                # Partial edge blocks (unaligned S) are masked by Pallas; no
                # host-side pad/slice round trip.
                pl.BlockSpec((Bb, C, TS), lambda b, s: (b, 0, s)),
                # Constant index_map: weight/bias stay resident across the grid.
                pl.BlockSpec((1, C, 1), lambda b, s: (0, 0, 0)),
                pl.BlockSpec((1, C, 1), lambda b, s: (0, 0, 0)),
            ],
            out_specs=pl.BlockSpec((Bb, C, TS), lambda b, s: (b, 0, s)),
        ),
        compiler_params=pltpu.CompilerParams(
            dimension_semantics=("parallel", "parallel"),
            vmem_limit_bytes=vmem_limit,
        ),
        cost_estimate=pl.CostEstimate(
            flops=7 * B * C * S,
            transcendentals=B * S,
            bytes_accessed=2 * B * C * S * itemsize + 2 * C * 4,
        ),
    )(x3, w3, b3)

    return out3.reshape(B, C, H, W, D)


def _reference(x, weight, bias, eps=1e-6):
    u = jnp.mean(x, axis=1, keepdims=True)
    s = jnp.mean((x - u) ** 2, axis=1, keepdims=True)
    xn = (x - u) / jnp.sqrt(s + eps)
    return weight[None, :, None, None, None] * xn + bias[None, :, None, None, None]


if __name__ == "__main__":
    key = jax.random.PRNGKey(0)
    k1, k2, k3, k4, k5 = jax.random.split(key, 5)

    # Case 1: small [B, C, H, W, D] input, full-extent spatial block, auto tiles.
    B, C, H, W, D = 2, 4, 4, 4, 8
    x = jax.random.normal(k1, (B, C, H, W, D), dtype=jnp.float32)
    weight = jnp.ones((C,), dtype=jnp.float32)   # matches nn.Parameter(torch.ones(C))
    bias = jnp.zeros((C,), dtype=jnp.float32)    # matches nn.Parameter(torch.zeros(C))

    out = layer_norm_channel(x, weight, bias, eps=1e-6)
    out = jax.block_until_ready(out)
    ref = _reference(x, weight, bias, eps=1e-6)
    assert out.shape == x.shape and out.dtype == x.dtype
    assert jnp.allclose(out, ref, atol=1e-5, rtol=1e-5), "case 1 mismatch vs reference"

    # Case 2: non-128-multiple spatial size (S = 300), forced spatial tile of
    # 128 so the masked partial edge block (no host-side pad/slice) is
    # exercised, plus non-trivial weight/bias.
    B2, C2, H2, W2, D2 = 1, 8, 5, 6, 10
    x2 = jax.random.normal(k2, (B2, C2, H2, W2, D2), dtype=jnp.float32)
    w2 = jax.random.normal(k3, (C2,), dtype=jnp.float32)
    b2 = jax.random.normal(k4, (C2,), dtype=jnp.float32)

    out2 = layer_norm_channel(x2, w2, b2, eps=1e-6, spatial_tile=128)
    out2 = jax.block_until_ready(out2)
    ref2 = _reference(x2, w2, b2, eps=1e-6)
    assert out2.shape == x2.shape and out2.dtype == x2.dtype
    assert jnp.allclose(out2, ref2, atol=1e-5, rtol=1e-5), "case 2 mismatch vs reference"

    # Case 3: tiny-C batch packing path (Bb = 2 rows per block, reduction over
    # the middle channel axis of a (Bb, C, TS) tile).
    B3, C3, H3, W3, D3 = 4, 4, 2, 4, 16
    x3 = jax.random.normal(k5, (B3, C3, H3, W3, D3), dtype=jnp.float32)
    w3 = jnp.ones((C3,), dtype=jnp.float32)
    b3 = jnp.zeros((C3,), dtype=jnp.float32)

    out3 = layer_norm_channel(x3, w3, b3, eps=1e-6, batch_tile=2)
    out3 = jax.block_until_ready(out3)
    ref3 = _reference(x3, w3, b3, eps=1e-6)
    assert out3.shape == x3.shape and out3.dtype == x3.dtype
    assert jnp.allclose(out3, ref3, atol=1e-5, rtol=1e-5), "case 3 mismatch vs reference"

    print("KERNEL_OK")
</pallas_src>

<mosaic_0001>
module attributes {stable_mosaic.version = 11 : i64} {
  func.func @_ln_channel_kernel(%arg0: i32, %arg1: i32, %arg2: memref<1x4x128xf32, #tpu.memory_space<vmem>>, %arg3: memref<1x4x1xf32, #tpu.memory_space<vmem>>, %arg4: memref<1x4x1xf32, #tpu.memory_space<vmem>>, %arg5: memref<1x4x128xf32, #tpu.memory_space<vmem>>) attributes {dimension_semantics = [#tpu.dimension_semantics<parallel>, #tpu.dimension_semantics<parallel>], iteration_bounds = array<i64: 2, 1>, scalar_prefetch = 0 : i64, scratch_operands = 0 : i64, tpu.core_type = #tpu.core_type<tc>, window_params = [{transform_indices = @transform_0, window_bounds = array<i64: 1, 4, 128>}, {pipeline_mode = #tpu.pipeline_mode<synchronous>, transform_indices = @transform_1, window_bounds = array<i64: 1, 4, 1>}, {pipeline_mode = #tpu.pipeline_mode<synchronous>, transform_indices = @transform_2, window_bounds = array<i64: 1, 4, 1>}, {transform_indices = @transform_3, window_bounds = array<i64: 1, 4, 128>}]} {
    %c0 = arith.constant 0 : index
    %c0_0 = arith.constant 0 : index
    %c0_1 = arith.constant 0 : index
    %0 = vector.load %arg2[%c0, %c0_0, %c0_1] : memref<1x4x128xf32, #tpu.memory_space<vmem>>, vector<1x4x128xf32>
    %cst = arith.constant dense<0.000000e+00> : vector<1x128xf32>
    %1 = vector.multi_reduction <add>, %0, %cst [1] : vector<1x4x128xf32> to vector<1x128xf32>
    %2 = vector.shape_cast %1 : vector<1x128xf32> to vector<1x1x128xf32>
    %cst_2 = arith.constant 2.500000e-01 : f32
    %3 = vector.broadcast %cst_2 : f32 to vector<1x1x128xf32>
    %4 = arith.mulf %2, %3 : vector<1x1x128xf32>
    %5 = arith.mulf %0, %0 : vector<1x4x128xf32>
    %cst_3 = arith.constant dense<0.000000e+00> : vector<1x128xf32>
    %6 = vector.multi_reduction <add>, %5, %cst_3 [1] : vector<1x4x128xf32> to vector<1x128xf32>
    %7 = vector.shape_cast %6 : vector<1x128xf32> to vector<1x1x128xf32>
    %cst_4 = arith.constant 2.500000e-01 : f32
    %8 = vector.broadcast %cst_4 : f32 to vector<1x1x128xf32>
    %9 = arith.mulf %7, %8 : vector<1x1x128xf32>
    %10 = arith.mulf %4, %4 : vector<1x1x128xf32>
    %11 = arith.subf %9, %10 : vector<1x1x128xf32>
    %cst_5 = arith.constant 0.000000e+00 : f32
    %12 = vector.broadcast %cst_5 : f32 to vector<1x1x128xf32>
    %13 = arith.maximumf %11, %12 : vector<1x1x128xf32>
    %cst_6 = arith.constant 9.99999997E-7 : f32
    %14 = vector.broadcast %cst_6 : f32 to vector<1x1x128xf32>
    %15 = arith.addf %13, %14 : vector<1x1x128xf32>
    %16 = math.rsqrt %15 : vector<1x1x128xf32>
    %c0_7 = arith.constant 0 : index
    %c0_8 = arith.constant 0 : index
    %c0_9 = arith.constant 0 : index
    %17 = vector.load %arg3[%c0_7, %c0_8, %c0_9] : memref<1x4x1xf32, #tpu.memory_space<vmem>>, vector<1x4x1xf32>
    %c0_10 = arith.constant 0 : index
    %c0_11 = arith.constant 0 : index
    %c0_12 = arith.constant 0 : index
    %18 = vector.load %arg4[%c0_10, %c0_11, %c0_12] : memref<1x4x1xf32, #tpu.memory_space<vmem>>, vector<1x4x1xf32>
    %19 = vector.broadcast %4 : vector<1x1x128xf32> to vector<1x4x128xf32>
    %20 = arith.subf %0, %19 : vector<1x4x128xf32>
    %21 = vector.broadcast %17 : vector<1x4x1xf32> to vector<1x4x128xf32>
    %22 = vector.broadcast %16 : vector<1x1x128xf32> to vector<1x4x128xf32>
    %23 = arith.mulf %21, %22 : vector<1x4x128xf32>
    %24 = arith.mulf %20, %23 : vector<1x4x128xf32>
    %25 = vector.broadcast %18 : vector<1x4x1xf32> to vector<1x4x128xf32>
    %26 = arith.addf %24, %25 : vector<1x4x128xf32>
    %c0_13 = arith.constant 0 : index
    %c0_14 = arith.constant 0 : index
    %c0_15 = arith.constant 0 : index
    %27 = vector.load %arg5[%c0_13, %c0_14, %c0_15] : memref<1x4x128xf32, #tpu.memory_space<vmem>>, vector<1x4x128xf32>
    tpu.vector_store %arg5[%c0_13, %c0_14, %c0_15], %26 {strides = array<i32>} : memref<1x4x128xf32, #tpu.memory_space<vmem>>, vector<1x4x128xf32>,
    return
  }
  func.func @transform_0(%arg0: i32, %arg1: i32) -> (i32, i32, i32) {
    %c0_i32 = arith.constant 0 : i32
    %c0_i32_0 = arith.constant 0 : i32
    return %arg0, %c0_i32, %arg1 : i32, i32, i32
  }
  func.func @transform_1(%arg0: i32, %arg1: i32) -> (i32, i32, i32) {
    %c0_i32 = arith.constant 0 : i32
    %c0_i32_0 = arith.constant 0 : i32
    %c0_i32_1 = arith.constant 0 : i32
    %c0_i32_2 = arith.constant 0 : i32
    return %c0_i32, %c0_i32_0, %c0_i32_1 : i32, i32, i32
  }
  func.func @transform_2(%arg0: i32, %arg1: i32) -> (i32, i32, i32) {
    %c0_i32 = arith.constant 0 : i32
    %c0_i32_0 = arith.constant 0 : i32
    %c0_i32_1 = arith.constant 0 : i32
    %c0_i32_2 = arith.constant 0 : i32
    return %c0_i32, %c0_i32_0, %c0_i32_1 : i32, i32, i32
  }
  func.func @transform_3(%arg0: i32, %arg1: i32) -> (i32, i32, i32) {
    %c0_i32 = arith.constant 0 : i32
    %c0_i32_0 = arith.constant 0 : i32
    return %arg0, %c0_i32, %arg1 : i32, i32, i32
  }
}

</mosaic_0001>

<bundles_post_ra>
// kernel: tpu_custom_call.1
= control target key start
LH: loop header
LB: loop body
LE: loop exit
PB: predicated region body
PF: predicated region fallthrough
CT: control target
= control target key end

     0   :  { %8 = vsyncpa [#allocation3], 0  ;;  %s608_s0 = inlined_call_operand.vmem [shape: f32[2,4,128], index: 0, kind: input, shape index: {}]   ;;  %s609_s1 = inlined_call_operand.vmem [shape: f32[1,4,1], index: 1, kind: input, shape index: {}]   ;;  %s610_s2 = inlined_call_operand.vmem [shape: f32[1,4,1], index: 2, kind: input, shape index: {}]   ;;  %s611_s3 = inlined_call_operand.hbm [shape: f32[2,4,128], index: 3, kind: output, shape index: {}]  }
   0x1   :  { %10 = vsyncpa [#allocation3 + $0x1], 0  ;;  %s490_s12 = smov 0   ;;  %s492_s13 = smov 0  }
   0x2   :  { %s494_s14 = smov 0   ;;  %s496_s15 = smov 0  }
   0x3   :  { %s498_s16 = smov 0   ;;  %s500_s17 = smov 0  }
   0x4 LB: > { %s318_s18 = sadd.s32 4294967295, %s466_s17   ;;  %s319_s19 = sadd.s32 4294967294, %s466_s17   ;;  %s466_s17 = sphi %s500_s17, %s16_s17   ;;  %s462_s16 = sphi %s498_s16, %s618_s16   ;;  %s458_s15 = sphi %s496_s15, %s617_s15   ;;  %s454_s14 = sphi %s494_s14, %s616_s14   ;;  %s450_s13 = sphi %s492_s13, %s615_s13   ;;  %s446_s12 = sphi %s490_s12, %s614_s12  }
   0x5   : > { %s28_s20 = sadd.s32 1, %s462_s16  ;;  %s107_s21 = sadd.s32 1, %s454_s14 }
   0x6   : > { %p30_p0 = scmp.ge.s32.totalorder %s28_s20, 2  ;;  %p117_p1 = scmp.ne.s32.totalorder %s454_s14, %s450_s13 }
   0x7   : > { %p118_p2 = scmp.eq.s32.totalorder %s318_s18, 1  ;;  %p123_p3 = scmp.ne.s32.totalorder %s450_s13, %s446_s12 }
   0x8   : > { %s620_s20 = smov (%p30_p0, %s28_s20), 0  ;;  %p124_p5 = scmp.eq.s32.totalorder %s319_s19, 1 }
   0x9   : > { %p530_p4 = por %p118_p2, %p117_p1  ;;  %s102_s23 = ssub.s32 %s462_s16, %s620_s20 }
   0xa   : > { %p322_p6 = scmp.ge.s32.totalorder %s466_s17, 1  ;;  %p105_p7 = scmp.eq.s32.totalorder %s102_s23, 0 }
   0xb   : > { %p537_p8 = por %p124_p5, %p123_p3  ;;  %p158_p9 = scmp.lt.s32.totalorder %s466_s17, 3 }
   0xc   : > { %s543_s25 = scalar_select %p105_p7, %s454_s14, %s107_s21  }
   0xd   : > { %p159_p10 = pnand %p322_p6, %p158_p9 }
   0xe   : > { %v215_v0 = vld [vmem:[%s609_s1] sm:$0xf] (!%p159_p10)  ;;  %v468_v1 = vmov (!%p159_p10), 0   ;;  %p184_p11 = scmp.lt.s32.totalorder (!%p159_p10), %s458_s15, 1  ;;  %vm192_vm0 = vcmask (!%p159_p10), 1043456   ;;  %s181_s8 = sand.u32 (!%p159_p10), 1, %s450_s13  }
   0xf   : > { %162 = sbr.rel (%p159_p10) target bundleno = 164 (0xa4), region = 32  ;;  %385 = vset.pattern.permute.xlu0 (!%p159_p10), %v468_v1  ;;  %v216_v2 = vld [vmem:[%s610_s2] sm:$0xf] (!%p159_p10)  ;;  %s323_s9 = sshll.u32 (!%p159_p10), %s181_s8, 2 }
  0x10   : > { %220 = vperm.xlu0 (!%p159_p10), %385, %v215_v0   ;;  %s326_s10 = sshll.u32 (!%p159_p10), %s458_s15, 6  ;;  %s183_s11 = scalar_lea.vmem (!%p159_p10), [#allocation2], %s323_s9 }
  0x11   : > { %s247_s18 = sshll.u32 (!%p159_p10), %s183_s11, 4  ;;  %s561_s23 = scalar_lea.hbm (!%p159_p10), %s611_s3, %s326_s10  ;;  %s563_s18 = int_to_ptr.vmem [resolvable:$true] %s247_s18 }
  0x12   : > { %s233_s26 = scalar_lea.sflag (!%p159_p10), [#allocation3], %s181_s8  ;;  %s388_s27 = scalar_lea.vmem (!%p159_p10), %s563_s18, 64 }
  0x13   : > { %p389_p12 = scmp.ne.s32.totalorder (!%p159_p10), %s563_s18, %s388_s27 }
  0x14   : > { %227 = vperm.xlu0 (!%p159_p10), %385, %v216_v2  }
  0x15   : > { %p390_p13 = pnand (!%p159_p10), %p389_p12, %p530_p4 }
  0x16   : > { %s185_s30 = scalar_select %p184_p11, %s458_s15, 1 }
  0x17   : > { %p391_p0 = pneg %p390_p13  ;;  %s469_s15 = smov [#allocation2]  }
  0x18   : > { %s324_s4 = sshll.u32 %s185_s30, 2  ;;  %s392_s28 = sshll.u32 %s469_s15, 4  ;;  %s393_s28 = int_to_ptr.vmem [resolvable:$false] %s392_s28 }
  0x19   : > { %s190_s7 = scalar_lea.vmem %s608_s0, %s324_s4  ;;  %s394_s29 = scalar_lea.vmem %s393_s28, 128 }
  0x1a   : > { %v191_v3 = vld [vmem:[%s190_s7] sm:$0xf]  ;;  %p395_p1 = scmp.lt.s32.totalorder %s563_s18, %s393_s28  ;;  %p396_p2 = scmp.lt.s32.totalorder %s394_s29, %s388_s27 }
  0x1b   : > { %v193_v4 = vsel %vm192_vm0, %v191_v3, 0.0  ;;  %v201_v5 = vmul.f32 %v191_v3, %v191_v3 }
  0x1c   : > { %v194_v6 = vrot.slane %v193_v4, 4  ;;  %p397_p3 = por %p396_p2, %p395_p1 }
  0x1d   : > { %v202_v7 = vsel %vm192_vm0, %v201_v5, 0.0 }
  0x1e   : > { %v195_v8 = vadd.f32 %v194_v6, %v193_v4  ;;  %v203_v9 = vrot.slane %v202_v7, 4  ;;  %p398_p5 = pnand %p397_p3, %p391_p0 }
  0x20   : > { %v196_v10 = vrot.slane %v195_v8, 2  ;;  %v204_v11 = vadd.f32 %v203_v9, %v202_v7 }
  0x22   : > { %v197_v12 = vadd.f32 %v196_v10, %v195_v8  ;;  %v205_v13 = vrot.slane %v204_v11, 2 }
  0x24   : > { %v198_v14 = vrot.slane %v197_v12, 1  ;;  %v206_v15 = vadd.f32 %v205_v13, %v204_v11 }
  0x26   : > { %v199_v16 = vadd.f32 %v198_v14, %v197_v12  ;;  %v207_v17 = vrot.slane %v206_v15, 1 }
  0x28   : > { %v200_v18 = vmul.f32 0.25, %v199_v16  ;;  %v208_v19 = vadd.f32 %v207_v17, %v206_v15 }
  0x2a   : > { %v209_v20 = vmul.f32 0.25, %v208_v19  ;;  %v210_v21 = vmul.f32 %v200_v18, %v200_v18  ;;  %v217_v26 = vsub.f32 %v191_v3, %v200_v18 }
  0x2c   : > { %v211_v22 = vsub.f32 %v209_v20, %v210_v21 }
  0x2e   : > { %v212_v23 = vmax.f32 %v211_v22, 0.0 }
  0x30   : > { %v213_v24 = vadd.f32 1e-06, %v212_v23 }
  0x32   : > { %386 = vrsqrt.f32 %v213_v24 }
  0x3c   : > { %v387_v25 = vpop.eup %386 }
  0x8f   : > { %v221_v27 = vpop.permute.xlu0 %220 }
  0x90   : > { %v223_v28 = vmul.f32 %v387_v25, %v221_v27 }
  0x92   : > { %v224_v29 = vmul.f32 %v223_v28, %v217_v26 }
  0x93   : > { %v228_v30 = vpop.permute.xlu0 %227 }
  0x94   : > { %v230_v31 = vadd.f32 %v228_v30, %v224_v29 }
  0x96   : > { %231 = vst [vmem:[%s183_s11] sm:$0xf] %v230_v31 }
  0x97   : > { %401 = shalt.err (!%p398_p5)
}
  0x98   : > { %s402_s30 = scalar_lea.hbm %s561_s23, 64  ;;  %s406_s6 = scalar_lea.hbm %s611_s3, 128 }
  0x99   : > { %p403_p6 = scmp.ne.s32.totalorder %s561_s23, %s402_s30  ;;  %p407_p10 = scmp.lt.u32.totalorder %s561_s23, %s611_s3 }
  0x9a   : > { %p408_p11 = scmp.lt.u32.totalorder %s406_s6, %s402_s30  ;;  %p410_p13 = scmp.lt.u32.totalorder %s402_s30, %s561_s23 }
  0x9b   : > { %p404_p7 = pnand %p403_p6, %p530_p4 }
  0x9c   : > { %p409_p12 = por %p408_p11, %p407_p10 }
  0x9d   : > { %p405_p9 = pneg %p404_p7 }
  0x9e   : > { %p411_p0 = por %p410_p13, %p409_p12 }
  0xa0   : > { %p412_p1 = pnand %p411_p0, %p405_p9 }
  0xa2   : > { %415 = shalt.err (!%p412_p1)
}
  0xa3   : > { %329 = dma.vmem_to_hbm [thread:$0]  (%p530_p4), %s563_s18, 64, %s561_s23, %s233_s26  }
  0xa4 PF: > { %p335_p2 = scmp.ge.s32.totalorder %s466_s17, 2  ;;  %s259_s9 = sand.u32 1, %s446_s12  }
  0xa5   : > { %s260_s10 = scalar_lea.sflag [#allocation3], %s259_s9 }
  0xa6   : > { %p332_p3 = pnand %p335_p2, %p537_p8 }
  0xa8   : > { %441 = dma.done.wait (!%p332_p3), %s260_s10, 64  }
  0xa9   : > { %443 = vsyncadd (!%p332_p3), %s260_s10, 4294967232  ;;  %s16_s17 = sadd.s32 1, %s466_s17   ;;  %s614_s12 = smov %s450_s13 }
  0xaa   : > { %p13_p5 = scmp.ge.s32.totalorder %s16_s17, 4   ;;  %s615_s13 = smov %s454_s14 }
  0xab   : > { %s616_s14 = smov %s543_s25  ;;  %s617_s15 = smov %s462_s16 }
  0xac   : > { %s618_s16 = smov %s620_s20  ;;  %15 = sbr.rel (!%p13_p5) target bundleno = 4 (0x4), region = 67 }
  0xb3   :  { %265 = vsyncpa [#allocation3], 1 }
  0xb4   :  { %267 = vsyncpa [#allocation3 + $0x1], 1 }

</bundles_post_ra>
